<compile_context>
chip_gen: v7x
topology: tpu7x:2x2x1
jax: 0.10.0
libtpu: 0.0.40
codegen_flags: <defaults>
</compile_context>

<pallas_src>
import functools

import jax
import jax.numpy as jnp
from jax.experimental import pallas as pl
from jax.experimental.pallas import tpu as pltpu

_NEG = -1.0e30          # finite "minus infinity": exp underflows to exactly 0,
                        # differences stay finite -> no NaN-repair select.
_MAX_BLOCK_C = 2048     # class-chunk width (lanes) for vocab-scale C.


def _kd_loss_kernel(s_ref, t_ref, o_ref, m_s, m_t, l_s, l_t, acc, *,
                    inv_t, batch, num_classes, block_b, block_c,
                    mask_rows, mask_cols):
    i = pl.program_id(0)          # batch tile   ("parallel")
    k = pl.program_id(1)          # class chunk  ("arbitrary": online LSE carry)

    @pl.when(k == 0)
    def _init():
        m_s[...] = jnp.full_like(m_s, _NEG)
        m_t[...] = jnp.full_like(m_t, _NEG)
        l_s[...] = jnp.zeros_like(l_s)
        l_t[...] = jnp.zeros_like(l_t)
        acc[...] = jnp.zeros_like(acc)

    s = s_ref[...].astype(jnp.float32)
    t = t_ref[...].astype(jnp.float32)

    # Ragged last batch tile / class chunk: overwrite out-of-range positions in
    # BOTH tensors with the same large finite negative.  Masked rows then carry
    # identical "distributions" (zero KL); masked columns underflow to 0 in the
    # exponentials with no NaN hazard.
    if mask_rows or mask_cols:
        valid = None
        if mask_rows:
            row = jax.lax.broadcasted_iota(jnp.int32, (block_b, block_c), 0)
            valid = (i * block_b + row) < batch
        if mask_cols:
            col = jax.lax.broadcasted_iota(jnp.int32, (block_b, block_c), 1)
            col_ok = (k * block_c + col) < num_classes
            valid = col_ok if valid is None else (valid & col_ok)
        neg = jnp.float32(_NEG)
        s = jnp.where(valid, s, neg)
        t = jnp.where(valid, t, neg)

    inv_t_f = jnp.float32(inv_t)

    # Online log-sum-exp carry.  1/T is folded into the post-max subtraction
    # (max is invariant to a positive scale), so no standalone scale pass.
    m_s_prev = m_s[...]
    m_t_prev = m_t[...]
    m_s_new = jnp.maximum(m_s_prev, jnp.max(s, axis=1, keepdims=True))
    m_t_new = jnp.maximum(m_t_prev, jnp.max(t, axis=1, keepdims=True))

    alpha_s = jnp.exp((m_s_prev - m_s_new) * inv_t_f)
    alpha_t = jnp.exp((m_t_prev - m_t_new) * inv_t_f)

    e_s = jnp.exp((s - m_s_new) * inv_t_f)
    e_t = jnp.exp((t - m_t_new) * inv_t_f)

    l_s[...] = alpha_s * l_s[...] + jnp.sum(e_s, axis=1, keepdims=True)
    l_t[...] = alpha_t * l_t[...] + jnp.sum(e_t, axis=1, keepdims=True)
    # acc = sum_j exp((t_j - m_t)/T) * (t_j - s_j)   (raw-logit difference).
    acc[...] = alpha_t * acc[...] + jnp.sum(e_t * (t - s), axis=1, keepdims=True)
    m_s[...] = m_s_new
    m_t[...] = m_t_new

    @pl.when(k == pl.num_programs(1) - 1)
    def _finalize():
        # row_kl = (acc/l_t + m_s - m_t)/T + log(l_s) - log(l_t)
        row_kl = ((acc[...] / l_t[...] + (m_s[...] - m_t[...])) * inv_t_f
                  + (jnp.log(l_s[...]) - jnp.log(l_t[...])))
        # Lane-dense (1, 8, 128) partial-sum block -> unmasked vector stores.
        o_ref[...] = jnp.full(o_ref.shape, jnp.sum(row_kl), dtype=jnp.float32)


def _round_up(x, m):
    return (x + m - 1) // m * m


def _vmem_capacity_bytes():
    try:
        cap = int(getattr(pltpu.get_tpu_info(), "vmem_capacity_bytes", 0))
        if cap > 0:
            return cap
    except Exception:
        pass
    return 64 * 1024 * 1024   # conservative default (v7x per-core VMEM)


def kd_loss(s_out, t_out, kl_loss_factor=1.0, temperature=4.0,
            batch_tile=None, class_tile=None):
    """Pallas equivalent of KDLoss(kl_loss_factor, T)(s_out, t_out)."""
    assert s_out.shape == t_out.shape and s_out.ndim == 2
    B, C = s_out.shape
    itemsize = jnp.dtype(s_out.dtype).itemsize

    # ---- generation-aware VMEM budget --------------------------------------
    vmem_cap = _vmem_capacity_bytes()
    # ~56 MiB on 64 MiB parts (v7x), ~96 MiB on 128 MiB parts (v5e/v6e).
    vmem_limit = int(min(vmem_cap - 8 * 1024 * 1024, 96 * 1024 * 1024))

    # ---- class chunk (lane axis) -------------------------------------------
    if class_tile is not None:
        bc = min(_round_up(int(class_tile), 128), _round_up(C, 128))
        if bc >= C:
            bc = C                      # single full-class block (always legal)
    else:
        bc = C if C <= _MAX_BLOCK_C else _MAX_BLOCK_C

    # ---- batch tile (sublane axis) -----------------------------------------
    if batch_tile is not None:
        tb = max(8, _round_up(int(batch_tile), 16))
    else:
        # Working set per batch row: 2 tensors x 2 pipeline buffers of the
        # input dtype + ~5 live f32 (tb, bc) intermediates around the
        # reduction barriers.  Keep within ~80% of the scoped-VMEM limit.
        per_row = bc * (4 * itemsize + 4 * 5)
        tb = (int(0.8 * vmem_limit) // per_row) // 16 * 16
        tb = max(16, min(tb, 1024))
        tb = min(tb, _round_up(B, 16))
        if B >= 32:
            # Keep >= 2 batch tiles so the "parallel" axis can be split across
            # both v7x TensorCores (harmless on single-TC v5e/v6e).
            tb = min(tb, _round_up(pl.cdiv(B, 2), 16))
    if tb >= B:
        tb = B                          # one full-dim batch block (always legal)

    grid_b = pl.cdiv(B, tb)
    grid_c = pl.cdiv(C, bc)
    mask_rows = (B % tb) != 0
    mask_cols = (C % bc) != 0

    kernel = functools.partial(
        _kd_loss_kernel,
        inv_t=float(1.0 / temperature),
        batch=B, num_classes=C, block_b=tb, block_c=bc,
        mask_rows=mask_rows, mask_cols=mask_cols,
    )

    cost = pl.CostEstimate(
        flops=12 * B * C,
        transcendentals=2 * B * C,
        bytes_accessed=2 * B * C * itemsize + grid_b * 8 * 128 * 4,
    )

    partials = pl.pallas_call(
        kernel,
        out_shape=jax.ShapeDtypeStruct((grid_b, 8, 128), jnp.float32),
        grid=(grid_b, grid_c),
        in_specs=[
            pl.BlockSpec((tb, bc), lambda i, k: (i, k)),
            pl.BlockSpec((tb, bc), lambda i, k: (i, k)),
        ],
        out_specs=pl.BlockSpec((1, 8, 128), lambda i, k: (i, 0, 0)),
        scratch_shapes=[pltpu.VMEM((tb, 1), jnp.float32)] * 5,
        compiler_params=pltpu.CompilerParams(
            dimension_semantics=("parallel", "arbitrary"),
            vmem_limit_bytes=vmem_limit,
        ),
        cost_estimate=cost,
    )(s_out, t_out)

    t_f = jnp.float32(temperature)
    scale = t_f * t_f * jnp.float32(kl_loss_factor) / jnp.float32(B)
    return jnp.sum(partials[:, 0, 0]) * scale


def _reference(s, t, factor, temperature):
    # Stable pure-JAX reference.
    log_p_s = jax.nn.log_softmax(s / temperature, axis=1)
    log_p_t = jax.nn.log_softmax(t / temperature, axis=1)
    p_t = jnp.exp(log_p_t)
    kl = jnp.sum(p_t * (log_p_t - log_p_s)) / s.shape[0]
    return kl * temperature * temperature * factor


if __name__ == "__main__":
    key = jax.random.PRNGKey(0)
    k1, k2, k3, k4, k5, k6 = jax.random.split(key, 6)

    # Case 1: tiny classifier logits (B=8, C=32), f32, single full-dim block.
    B1, C1 = 8, 32
    s1 = jax.random.normal(k1, (B1, C1), dtype=jnp.float32)
    t1 = jax.random.normal(k2, (B1, C1), dtype=jnp.float32)
    out1 = kd_loss(s1, t1, kl_loss_factor=1.0, temperature=4.0)
    jax.block_until_ready(out1)
    ref1 = _reference(s1, t1, 1.0, 4.0)
    assert jnp.allclose(out1, ref1, atol=1e-5, rtol=1e-4), (out1, ref1)

    # Case 2: ragged rows AND columns with a forced multi-tile grid on both
    # axes (exercises the in-kernel row/col masking, the online-LSE class
    # carry across chunks, and the per-tile partial-sum path).
    B2, C2 = 40, 200
    s2 = jax.random.normal(k3, (B2, C2), dtype=jnp.float32)
    t2 = jax.random.normal(k4, (B2, C2), dtype=jnp.float32)
    out2 = kd_loss(s2, t2, kl_loss_factor=0.5, temperature=2.0,
                   batch_tile=16, class_tile=128)
    jax.block_until_ready(out2)
    ref2 = _reference(s2, t2, 0.5, 2.0)
    assert jnp.allclose(out2, ref2, atol=1e-5, rtol=1e-4), (out2, ref2)

    # Case 3: bf16 logits pass straight through (halved HBM traffic), f32 math.
    B3, C3 = 16, 384
    s3 = jax.random.normal(k5, (B3, C3), dtype=jnp.bfloat16)
    t3 = jax.random.normal(k6, (B3, C3), dtype=jnp.bfloat16)
    out3 = kd_loss(s3, t3, kl_loss_factor=1.0, temperature=4.0)
    jax.block_until_ready(out3)
    ref3 = _reference(s3.astype(jnp.float32), t3.astype(jnp.float32), 1.0, 4.0)
    assert jnp.allclose(out3, ref3, atol=1e-4, rtol=1e-3), (out3, ref3)

    print("KERNEL_OK")
</pallas_src>

<mosaic_0001>
module attributes {stable_mosaic.version = 11 : i64} {
  func.func @_kd_loss_kernel(%arg0: i32, %arg1: i32, %arg2: memref<8x32xf32, #tpu.memory_space<vmem>>, %arg3: memref<8x32xf32, #tpu.memory_space<vmem>>, %arg4: memref<1x8x128xf32, #tpu.memory_space<vmem>>, %arg5: memref<8x1xf32, #tpu.memory_space<vmem>>, %arg6: memref<8x1xf32, #tpu.memory_space<vmem>>, %arg7: memref<8x1xf32, #tpu.memory_space<vmem>>, %arg8: memref<8x1xf32, #tpu.memory_space<vmem>>, %arg9: memref<8x1xf32, #tpu.memory_space<vmem>>) attributes {dimension_semantics = [#tpu.dimension_semantics<parallel>, #tpu.dimension_semantics<arbitrary>], iteration_bounds = array<i64: 1, 1>, scalar_prefetch = 0 : i64, scratch_operands = 5 : i64, tpu.core_type = #tpu.core_type<tc>, window_params = [{transform_indices = @transform_0, window_bounds = array<i64: 8, 32>}, {transform_indices = @transform_1, window_bounds = array<i64: 8, 32>}, {transform_indices = @transform_2, window_bounds = array<i64: 1, 8, 128>}]} {
    %c0_i32 = arith.constant 0 : i32
    %0 = arith.cmpi eq, %arg1, %c0_i32 : i32
    %1 = arith.extui %0 : i1 to i32
    %c0_i32_0 = arith.constant 0 : i32
    %2 = arith.cmpi ne, %1, %c0_i32_0 : i32
    scf.if %2 {
      %cst_35 = arith.constant -1.000000e+30 : f32
      %56 = vector.broadcast %cst_35 : f32 to vector<8x1xf32>
      %c0_36 = arith.constant 0 : index
      %c0_37 = arith.constant 0 : index
      %57 = vector.load %arg5[%c0_36, %c0_37] : memref<8x1xf32, #tpu.memory_space<vmem>>, vector<8x1xf32>
      tpu.vector_store %arg5[%c0_36, %c0_37], %56 {strides = array<i32>} : memref<8x1xf32, #tpu.memory_space<vmem>>, vector<8x1xf32>,
      %cst_38 = arith.constant -1.000000e+30 : f32
      %58 = vector.broadcast %cst_38 : f32 to vector<8x1xf32>
      %c0_39 = arith.constant 0 : index
      %c0_40 = arith.constant 0 : index
      %59 = vector.load %arg6[%c0_39, %c0_40] : memref<8x1xf32, #tpu.memory_space<vmem>>, vector<8x1xf32>
      tpu.vector_store %arg6[%c0_39, %c0_40], %58 {strides = array<i32>} : memref<8x1xf32, #tpu.memory_space<vmem>>, vector<8x1xf32>,
      %cst_41 = arith.constant 0.000000e+00 : f32
      %60 = vector.broadcast %cst_41 : f32 to vector<8x1xf32>
      %c0_42 = arith.constant 0 : index
      %c0_43 = arith.constant 0 : index
      %61 = vector.load %arg7[%c0_42, %c0_43] : memref<8x1xf32, #tpu.memory_space<vmem>>, vector<8x1xf32>
      tpu.vector_store %arg7[%c0_42, %c0_43], %60 {strides = array<i32>} : memref<8x1xf32, #tpu.memory_space<vmem>>, vector<8x1xf32>,
      %cst_44 = arith.constant 0.000000e+00 : f32
      %62 = vector.broadcast %cst_44 : f32 to vector<8x1xf32>
      %c0_45 = arith.constant 0 : index
      %c0_46 = arith.constant 0 : index
      %63 = vector.load %arg8[%c0_45, %c0_46] : memref<8x1xf32, #tpu.memory_space<vmem>>, vector<8x1xf32>
      tpu.vector_store %arg8[%c0_45, %c0_46], %62 {strides = array<i32>} : memref<8x1xf32, #tpu.memory_space<vmem>>, vector<8x1xf32>,
      %cst_47 = arith.constant 0.000000e+00 : f32
      %64 = vector.broadcast %cst_47 : f32 to vector<8x1xf32>
      %c0_48 = arith.constant 0 : index
      %c0_49 = arith.constant 0 : index
      %65 = vector.load %arg9[%c0_48, %c0_49] : memref<8x1xf32, #tpu.memory_space<vmem>>, vector<8x1xf32>
      tpu.vector_store %arg9[%c0_48, %c0_49], %64 {strides = array<i32>} : memref<8x1xf32, #tpu.memory_space<vmem>>, vector<8x1xf32>,
    } else {
    }
    %c0 = arith.constant 0 : index
    %c0_1 = arith.constant 0 : index
    %3 = vector.load %arg2[%c0, %c0_1] : memref<8x32xf32, #tpu.memory_space<vmem>>, vector<8x32xf32>
    %c0_2 = arith.constant 0 : index
    %c0_3 = arith.constant 0 : index
    %4 = vector.load %arg3[%c0_2, %c0_3] : memref<8x32xf32, #tpu.memory_space<vmem>>, vector<8x32xf32>
    %c0_4 = arith.constant 0 : index
    %c0_5 = arith.constant 0 : index
    %5 = vector.load %arg5[%c0_4, %c0_5] : memref<8x1xf32, #tpu.memory_space<vmem>>, vector<8x1xf32>
    %c0_6 = arith.constant 0 : index
    %c0_7 = arith.constant 0 : index
    %6 = vector.load %arg6[%c0_6, %c0_7] : memref<8x1xf32, #tpu.memory_space<vmem>>, vector<8x1xf32>
    %cst = arith.constant dense<0xFF800000> : vector<8xf32>
    %7 = vector.multi_reduction <maximumf>, %3, %cst [1] : vector<8x32xf32> to vector<8xf32>
    %8 = vector.shape_cast %7 : vector<8xf32> to vector<8x1xf32>
    %9 = arith.maximumf %5, %8 : vector<8x1xf32>
    %cst_8 = arith.constant dense<0xFF800000> : vector<8xf32>
    %10 = vector.multi_reduction <maximumf>, %4, %cst_8 [1] : vector<8x32xf32> to vector<8xf32>
    %11 = vector.shape_cast %10 : vector<8xf32> to vector<8x1xf32>
    %12 = arith.maximumf %6, %11 : vector<8x1xf32>
    %13 = arith.subf %5, %9 : vector<8x1xf32>
    %cst_9 = arith.constant 2.500000e-01 : f32
    %14 = vector.broadcast %cst_9 : f32 to vector<8x1xf32>
    %15 = arith.mulf %13, %14 : vector<8x1xf32>
    %16 = math.exp %15 : vector<8x1xf32>
    %17 = arith.subf %6, %12 : vector<8x1xf32>
    %cst_10 = arith.constant 2.500000e-01 : f32
    %18 = vector.broadcast %cst_10 : f32 to vector<8x1xf32>
    %19 = arith.mulf %17, %18 : vector<8x1xf32>
    %20 = math.exp %19 : vector<8x1xf32>
    %21 = vector.broadcast %9 : vector<8x1xf32> to vector<8x32xf32>
    %22 = arith.subf %3, %21 : vector<8x32xf32>
    %cst_11 = arith.constant 2.500000e-01 : f32
    %23 = vector.broadcast %cst_11 : f32 to vector<8x32xf32>
    %24 = arith.mulf %22, %23 : vector<8x32xf32>
    %25 = math.exp %24 : vector<8x32xf32>
    %26 = vector.broadcast %12 : vector<8x1xf32> to vector<8x32xf32>
    %27 = arith.subf %4, %26 : vector<8x32xf32>
    %cst_12 = arith.constant 2.500000e-01 : f32
    %28 = vector.broadcast %cst_12 : f32 to vector<8x32xf32>
    %29 = arith.mulf %27, %28 : vector<8x32xf32>
    %30 = math.exp %29 : vector<8x32xf32>
    %c0_13 = arith.constant 0 : index
    %c0_14 = arith.constant 0 : index
    %31 = vector.load %arg7[%c0_13, %c0_14] : memref<8x1xf32, #tpu.memory_space<vmem>>, vector<8x1xf32>
    %32 = arith.mulf %16, %31 : vector<8x1xf32>
    %cst_15 = arith.constant dense<0.000000e+00> : vector<8xf32>
    %33 = vector.multi_reduction <add>, %25, %cst_15 [1] : vector<8x32xf32> to vector<8xf32>
    %34 = vector.shape_cast %33 : vector<8xf32> to vector<8x1xf32>
    %35 = arith.addf %32, %34 : vector<8x1xf32>
    %c0_16 = arith.constant 0 : index
    %c0_17 = arith.constant 0 : index
    %36 = vector.load %arg7[%c0_16, %c0_17] : memref<8x1xf32, #tpu.memory_space<vmem>>, vector<8x1xf32>
    tpu.vector_store %arg7[%c0_16, %c0_17], %35 {strides = array<i32>} : memref<8x1xf32, #tpu.memory_space<vmem>>, vector<8x1xf32>,
    %c0_18 = arith.constant 0 : index
    %c0_19 = arith.constant 0 : index
    %37 = vector.load %arg8[%c0_18, %c0_19] : memref<8x1xf32, #tpu.memory_space<vmem>>, vector<8x1xf32>
    %38 = arith.mulf %20, %37 : vector<8x1xf32>
    %cst_20 = arith.constant dense<0.000000e+00> : vector<8xf32>
    %39 = vector.multi_reduction <add>, %30, %cst_20 [1] : vector<8x32xf32> to vector<8xf32>
    %40 = vector.shape_cast %39 : vector<8xf32> to vector<8x1xf32>
    %41 = arith.addf %38, %40 : vector<8x1xf32>
    %c0_21 = arith.constant 0 : index
    %c0_22 = arith.constant 0 : index
    %42 = vector.load %arg8[%c0_21, %c0_22] : memref<8x1xf32, #tpu.memory_space<vmem>>, vector<8x1xf32>
    tpu.vector_store %arg8[%c0_21, %c0_22], %41 {strides = array<i32>} : memref<8x1xf32, #tpu.memory_space<vmem>>, vector<8x1xf32>,
    %c0_23 = arith.constant 0 : index
    %c0_24 = arith.constant 0 : index
    %43 = vector.load %arg9[%c0_23, %c0_24] : memref<8x1xf32, #tpu.memory_space<vmem>>, vector<8x1xf32>
    %44 = arith.mulf %20, %43 : vector<8x1xf32>
    %45 = arith.subf %4, %3 : vector<8x32xf32>
    %46 = arith.mulf %30, %45 : vector<8x32xf32>
    %cst_25 = arith.constant dense<0.000000e+00> : vector<8xf32>
    %47 = vector.multi_reduction <add>, %46, %cst_25 [1] : vector<8x32xf32> to vector<8xf32>
    %48 = vector.shape_cast %47 : vector<8xf32> to vector<8x1xf32>
    %49 = arith.addf %44, %48 : vector<8x1xf32>
    %c0_26 = arith.constant 0 : index
    %c0_27 = arith.constant 0 : index
    %50 = vector.load %arg9[%c0_26, %c0_27] : memref<8x1xf32, #tpu.memory_space<vmem>>, vector<8x1xf32>
    tpu.vector_store %arg9[%c0_26, %c0_27], %49 {strides = array<i32>} : memref<8x1xf32, #tpu.memory_space<vmem>>, vector<8x1xf32>,
    %c0_28 = arith.constant 0 : index
    %c0_29 = arith.constant 0 : index
    %51 = vector.load %arg5[%c0_28, %c0_29] : memref<8x1xf32, #tpu.memory_space<vmem>>, vector<8x1xf32>
    tpu.vector_store %arg5[%c0_28, %c0_29], %9 {strides = array<i32>} : memref<8x1xf32, #tpu.memory_space<vmem>>, vector<8x1xf32>,
    %c0_30 = arith.constant 0 : index
    %c0_31 = arith.constant 0 : index
    %52 = vector.load %arg6[%c0_30, %c0_31] : memref<8x1xf32, #tpu.memory_space<vmem>>, vector<8x1xf32>
    tpu.vector_store %arg6[%c0_30, %c0_31], %12 {strides = array<i32>} : memref<8x1xf32, #tpu.memory_space<vmem>>, vector<8x1xf32>,
    %c0_i32_32 = arith.constant 0 : i32
    %53 = arith.cmpi eq, %arg1, %c0_i32_32 : i32
    %54 = arith.extui %53 : i1 to i32
    %cst_33 = arith.constant 2.500000e-01 : f32
    %c0_i32_34 = arith.constant 0 : i32
    %55 = arith.cmpi ne, %54, %c0_i32_34 : i32
    scf.if %55 {
      %c0_35 = arith.constant 0 : index
      %c0_36 = arith.constant 0 : index
      %56 = vector.load %arg9[%c0_35, %c0_36] : memref<8x1xf32, #tpu.memory_space<vmem>>, vector<8x1xf32>
      %c0_37 = arith.constant 0 : index
      %c0_38 = arith.constant 0 : index
      %57 = vector.load %arg8[%c0_37, %c0_38] : memref<8x1xf32, #tpu.memory_space<vmem>>, vector<8x1xf32>
      %58 = arith.divf %56, %57 : vector<8x1xf32>
      %c0_39 = arith.constant 0 : index
      %c0_40 = arith.constant 0 : index
      %59 = vector.load %arg5[%c0_39, %c0_40] : memref<8x1xf32, #tpu.memory_space<vmem>>, vector<8x1xf32>
      %c0_41 = arith.constant 0 : index
      %c0_42 = arith.constant 0 : index
      %60 = vector.load %arg6[%c0_41, %c0_42] : memref<8x1xf32, #tpu.memory_space<vmem>>, vector<8x1xf32>
      %61 = arith.subf %59, %60 : vector<8x1xf32>
      %62 = arith.addf %58, %61 : vector<8x1xf32>
      %63 = vector.broadcast %cst_33 : f32 to vector<8x1xf32>
      %64 = arith.mulf %62, %63 : vector<8x1xf32>
      %c0_43 = arith.constant 0 : index
      %c0_44 = arith.constant 0 : index
      %65 = vector.load %arg7[%c0_43, %c0_44] : memref<8x1xf32, #tpu.memory_space<vmem>>, vector<8x1xf32>
      %66 = math.log %65 : vector<8x1xf32>
      %c0_45 = arith.constant 0 : index
      %c0_46 = arith.constant 0 : index
      %67 = vector.load %arg8[%c0_45, %c0_46] : memref<8x1xf32, #tpu.memory_space<vmem>>, vector<8x1xf32>
      %68 = math.log %67 : vector<8x1xf32>
      %69 = arith.subf %66, %68 : vector<8x1xf32>
      %70 = arith.addf %64, %69 : vector<8x1xf32>
      %71 = vector.shape_cast %70 : vector<8x1xf32> to vector<1x8x1xf32>
      %cst_47 = arith.constant dense<0.000000e+00> : vector<1xf32>
      %72 = vector.multi_reduction <add>, %71, %cst_47 [1, 2] : vector<1x8x1xf32> to vector<1xf32>
      %73 = vector.shape_cast %72 : vector<1xf32> to vector<1x1x1xf32>
      %74 = vector.extract %73[0, 0, 0] : f32 from vector<1x1x1xf32>
      %75 = vector.broadcast %74 : f32 to vector<1x8x128xf32>
      %c0_48 = arith.constant 0 : index
      %c0_49 = arith.constant 0 : index
      %c0_50 = arith.constant 0 : index
      %76 = vector.load %arg4[%c0_48, %c0_49, %c0_50] : memref<1x8x128xf32, #tpu.memory_space<vmem>>, vector<1x8x128xf32>
      tpu.vector_store %arg4[%c0_48, %c0_49, %c0_50], %75 {strides = array<i32>} : memref<1x8x128xf32, #tpu.memory_space<vmem>>, vector<1x8x128xf32>,
    } else {
    }
    return
  }
  func.func @transform_0(%arg0: i32, %arg1: i32) -> (i32, i32) {
    %c0_i32 = arith.constant 0 : i32
    return %arg0, %arg1 : i32, i32
  }
  func.func @transform_1(%arg0: i32, %arg1: i32) -> (i32, i32) {
    %c0_i32 = arith.constant 0 : i32
    return %arg0, %arg1 : i32, i32
  }
  func.func @transform_2(%arg0: i32, %arg1: i32) -> (i32, i32, i32) {
    %c0_i32 = arith.constant 0 : i32
    %c0_i32_0 = arith.constant 0 : i32
    %c0_i32_1 = arith.constant 0 : i32
    return %arg0, %c0_i32, %c0_i32_0 : i32, i32, i32
  }
}

</mosaic_0001>

<bundles_post_ra>
// kernel: tpu_custom_call.1
= control target key start
LH: loop header
LB: loop body
LE: loop exit
PB: predicated region body
PF: predicated region fallthrough
CT: control target
= control target key end

     0   :  { %7 = vsyncpa [#allocation8], 0  ;;  %s327_s0 = inlined_call_operand.hbm [shape: f32[8,32], index: 0, kind: input, shape index: {}]   ;;  %s328_s1 = inlined_call_operand.hbm [shape: f32[8,32], index: 1, kind: input, shape index: {}]   ;;  %s329_s2 = inlined_call_operand.hbm [shape: f32[1,8,128], index: 2, kind: output, shape index: {}]  }
   0x1   :  { %8 = vsyncpa [#allocation11], 0 }
   0x2   :  { %9 = vsyncpa [#allocation9], 0  ;;  %s254_s9 = smov [#allocation7]   ;;  %s255_s11 = smov [#allocation10]  }
   0x3   :  { %s16_s10 = sshll.u32 %s254_s9, 4  ;;  %s26_s12 = sshll.u32 %s255_s11, 4  ;;  %s17_s10 = int_to_ptr.vmem [resolvable:$true] %s16_s10  ;;  %s27_s12 = int_to_ptr.vmem [resolvable:$true] %s26_s12 }
   0x4   :  { %s182_s15 = scalar_lea.hbm %s327_s0, 128 }
   0x5   :  { %p183_p0 = scmp.ne.s32.totalorder %s327_s0, %s182_s15  ;;  %p186_p1 = scmp.lt.u32.totalorder %s182_s15, %s327_s0 }
   0x7   :  { %p188_p2 = pnand %p186_p1, %p183_p0 }
   0x9   :  { %191 = shalt.err (!%p188_p2)
}
   0xa   :  { %s192_s20 = scalar_lea.vmem %s17_s10, 128  ;;  %p197_p4 = scmp.lt.s32.totalorder %s17_s10, %s17_s10 }
   0xb   :  { %p193_p3 = scmp.ne.s32.totalorder %s17_s10, %s192_s20  ;;  %p198_p5 = scmp.lt.s32.totalorder %s192_s20, %s192_s20 }
   0xd   :  { %p199_p6 = por %p198_p5, %p197_p4 }
   0xf   :  { %p200_p7 = pnand %p199_p6, %p193_p3 }
  0x11   :  { %203 = shalt.err (!%p200_p7)
}
  0x12   :  { %19 = dma.hbm_to_vmem [thread:$0]  %s327_s0, 128, %s17_s10, [#allocation8]  }
  0x13   :  { %s204_s25 = scalar_lea.hbm %s328_s1, 128 }
  0x14   :  { %p205_p8 = scmp.ne.s32.totalorder %s328_s1, %s204_s25  ;;  %p208_p9 = scmp.lt.u32.totalorder %s204_s25, %s328_s1 }
  0x16   :  { %p210_p10 = pnand %p208_p9, %p205_p8 }
  0x18   :  { %213 = shalt.err (!%p210_p10)
}
  0x19   :  { %s214_s30 = scalar_lea.vmem %s27_s12, 128  ;;  %p219_p12 = scmp.lt.s32.totalorder %s27_s12, %s27_s12 }
  0x1a   :  { %p215_p11 = scmp.ne.s32.totalorder %s27_s12, %s214_s30  ;;  %p220_p13 = scmp.lt.s32.totalorder %s214_s30, %s214_s30 }
  0x1c   :  { %p221_p0 = por %p220_p13, %p219_p12 }
  0x1e   :  { %p222_p1 = pnand %p221_p0, %p215_p11 }
  0x20   :  { %225 = shalt.err (!%p222_p1)
}
  0x21   :  { %29 = dma.hbm_to_vmem [thread:$0]  %s328_s1, 128, %s27_s12, [#allocation11]  }
  0x22   :  { %248 = dma.done.wait [#allocation8], 128  }
  0x23   :  { %249 = vsyncadd [#allocation8], 4294967168 }
  0x24   :  { %250 = dma.done.wait [#allocation11], 128  }
  0x25   :  { %251 = vsyncadd [#allocation11], 4294967168  ;;  %vm40_vm0 = vcmask 7168   ;;  %v256_v0 = vmov -1e+30   ;;  %vm50_vm1 = vcmask 261120  }
  0x26   :  { %42 = vst.msk [vmem:[#allocation3] sm:$0xff] %vm40_vm0, %v256_v0  ;;  %41 = vst.msk [vmem:[#allocation2] sm:$0xff] %vm40_vm0, %v256_v0  ;;  %v47_v1 = vld [vmem:[#allocation10] sm:$0xff]  ;;  %v46_v2 = vld [vmem:[#allocation7] sm:$0xff]  ;;  %v257_v5 = vmov 0   ;;  %v258_v6 = vmov 0.0  }
  0x27   :  { %v55_v3 = vsel %vm50_vm1, %v47_v1, -inf  ;;  %v51_v4 = vsel %vm50_vm1, %v46_v2, -inf  ;;  %166 = vset.pattern.permute.xlu1 %v257_v5  ;;  %167 = vset.pattern.permute.xlu0 %v257_v5  ;;  %44 = vst.msk [vmem:[#allocation5] sm:$0xff] %vm40_vm0, %v258_v6  ;;  %43 = vst.msk [vmem:[#allocation4] sm:$0xff] %vm40_vm0, %v258_v6  ;;  %v102_v23 = vsub.f32 %v47_v1, %v46_v2  ;;  %s259_s1 = smov [#allocation12]  }
  0x28   :  { %56 = vmax.xlane.f32.xlu0 %v55_v3  ;;  %45 = vst.msk [vmem:[#allocation6] sm:$0xff] %vm40_vm0, %v258_v6  ;;  %s148_s4 = sshll.u32 %s259_s1, 4  ;;  %s149_s4 = int_to_ptr.vmem [resolvable:$true] %s148_s4 }
  0x29   :  { %s226_s6 = scalar_lea.vmem %s149_s4, 128  ;;  %p231_p3 = scmp.lt.s32.totalorder %s149_s4, %s149_s4 }
  0x2a   :  { %p227_p2 = scmp.ne.s32.totalorder %s149_s4, %s226_s6  ;;  %p232_p4 = scmp.lt.s32.totalorder %s226_s6, %s226_s6 }
  0x2c   :  { %52 = vmax.xlane.f32.xlu0 %v51_v4  ;;  %p233_p5 = por %p232_p4, %p231_p3 }
  0x2d   :  { %v49_v7 = vld [vmem:[#allocation3] sm:$0xff]  ;;  %v48_v10 = vld [vmem:[#allocation2] sm:$0xff] }
  0x2e   :  { %v93_v35 = vld [vmem:[#allocation5] sm:$0xff]  ;;  %v85_v40 = vld [vmem:[#allocation4] sm:$0xff]  ;;  %p234_p6 = pnand %p233_p5, %p227_p2 }
  0x2f   :  { %v100_v39 = vld [vmem:[#allocation6] sm:$0xff] }
  0xb5   :  { %v57_v8 = vpop.xlane.xlu0 %56 }
  0xb6   :  { %v58_v9 = vmax.f32 %v49_v7, %v57_v8 }
  0xb8   :  { %v63_v11 = vsub.f32 %v49_v7, %v58_v9  ;;  %110 = vst.msk [vmem:[#allocation3] sm:$0xff] %vm40_vm0, %v58_v9  ;;  %78 = vperm.xlu1 %166, %v58_v9  }
  0xb9   :  { %v53_v12 = vpop.xlane.xlu0 %52 }
  0xba   :  { %v54_v13 = vmax.f32 %v48_v10, %v53_v12  ;;  %v64_v30 = vmul.f32 0.25, %v63_v11 }
  0xbc   :  { %v59_v14 = vsub.f32 %v48_v10, %v54_v13  ;;  %109 = vst.msk [vmem:[#allocation2] sm:$0xff] %vm40_vm0, %v54_v13  ;;  %69 = vperm.xlu1 %166, %v54_v13   ;;  %v65_v31 = vmul.f32 1.442695, %v64_v30 }
  0xbe   :  { %v60_v32 = vmul.f32 0.25, %v59_v14 }
  0xbf   :  { %v119_v53 = vld [vmem:[#allocation3] sm:$0xff] }
  0xc0   :  { %v61_v33 = vmul.f32 1.442695, %v60_v32 }
  0xc3   :  { %v118_v50 = vld [vmem:[#allocation2] sm:$0xff] }
  0xc4   :  { %v120_v55 = vsub.f32 %v118_v50, %v119_v53 }
 0x137   :  { %v79_v15 = vpop.permute.xlu1 %78 }
 0x138   :  { %v81_v16 = vsub.f32 %v47_v1, %v79_v15 }
 0x13a   :  { %v82_v17 = vmul.f32 0.25, %v81_v16 }
 0x13b   :  { %v70_v18 = vpop.permute.xlu1 %69 }
 0x13c   :  { %v83_v19 = vmul.f32 1.442695, %v82_v17  ;;  %v72_v20 = vsub.f32 %v46_v2, %v70_v18 }
 0x13e   :  { %168 = vpow2.f32 %v83_v19  ;;  %v73_v21 = vmul.f32 0.25, %v72_v20 }
 0x140   :  { %v74_v22 = vmul.f32 1.442695, %v73_v21 }
 0x142   :  { %170 = vpow2.f32 %v74_v22 }
 0x143   :  { %172 = vpow2.f32 %v65_v31 }
 0x144   :  { %174 = vpow2.f32 %v61_v33 }
 0x148   :  { %v169_v24 = vpop.eup %168 }
 0x149   :  { %v95_v25 = vsel %vm50_vm1, %v169_v24, 0.0  ;;  %v103_v26 = vmul.f32 %v169_v24, %v102_v23 }
 0x14a   :  { %96 = vadd.xlane.f32.xlu0 %v95_v25 }
 0x14b   :  { %v104_v28 = vsel %vm50_vm1, %v103_v26, 0.0 }
 0x14c   :  { %v171_v27 = vpop.eup %170 }
 0x14d   :  { %v87_v29 = vsel %vm50_vm1, %v171_v27, 0.0  ;;  %v173_v34 = vpop.eup %172 }
 0x14e   :  { %105 = vadd.xlane.f32.xlu0 %v104_v28  ;;  %88 = vadd.xlane.f32.xlu1 %v87_v29  ;;  %v94_v36 = vmul.f32 %v173_v34, %v93_v35  ;;  %v175_v37 = vpop.eup %174  ;;  %v101_v42 = vmul.f32 %v173_v34, %v100_v39 }
 0x14f   :  { %v86_v43 = vmul.f32 %v175_v37, %v85_v40 }
 0x1d7   :  { %v97_v38 = vpop.xlane.xlu0 %96 }
 0x1d8   :  { %v98_v41 = vadd.f32 %v97_v38, %v94_v36 }
 0x1da   :  { %99 = vst.msk [vmem:[#allocation5] sm:$0xff] %vm40_vm0, %v98_v41 }
 0x1db   :  { %v106_v44 = vpop.xlane.xlu0 %105  ;;  %v89_v45 = vpop.xlane.xlu1 %88 }
 0x1dc   :  { %v107_v46 = vadd.f32 %v106_v44, %v101_v42  ;;  %v90_v47 = vadd.f32 %v89_v45, %v86_v43 }
 0x1de   :  { %108 = vst.msk [vmem:[#allocation6] sm:$0xff] %vm40_vm0, %v107_v46  ;;  %92 = vst.msk [vmem:[#allocation4] sm:$0xff] %vm40_vm0, %v90_v47 }
 0x1e1   :  { %v115_v48 = vld [vmem:[#allocation5] sm:$0xff] }
 0x1e2   :  { %176 = vrcp.f32 %v115_v48 }
 0x1e3   :  { %178 = vlog2.f32 %v115_v48 }
 0x1e5   :  { %v123_v49 = vld [vmem:[#allocation4] sm:$0xff]  ;;  %v114_v52 = vld [vmem:[#allocation6] sm:$0xff] }
 0x1e6   :  { %180 = vlog2.f32 %v123_v49 }
 0x1ec   :  { %v177_v51 = vpop.eup %176 }
 0x1ed   :  { %v117_v54 = vmul.f32 %v177_v51, %v114_v52  ;;  %v179_v56 = vpop.eup %178 }
 0x1ee   :  { %v127_v60 = vmul.f32 0.6931472, %v179_v56 }
 0x1ef   :  { %v121_v57 = vadd.f32 %v120_v55, %v117_v54 }
 0x1f0   :  { %v181_v58 = vpop.eup %180 }
 0x1f1   :  { %v125_v59 = vmul.f32 0.6931472, %v181_v58  ;;  %v122_v61 = vmul.f32 0.25, %v121_v57 }
 0x1f3   :  { %v128_v62 = vsub.f32 %v125_v59, %v127_v60 }
 0x1f5   :  { %v129_v63 = vadd.f32 %v128_v62, %v122_v61 }
 0x1f7   :  { %v130_v0 = vsel %vm40_vm0, %v129_v63, 0.0 }
 0x1f8   :  { %131 = vadd.xlane.f32.xlu0 %v130_v0 }
 0x285   :  { %v132_v1 = vpop.xlane.xlu0 %131 }
 0x286   :  { %v133_v2 = vrot.slane %v132_v1, 4 }
 0x288   :  { %v134_v3 = vadd.f32 %v133_v2, %v132_v1 }
 0x28a   :  { %v135_v4 = vrot.slane %v134_v3, 2 }
 0x28c   :  { %v136_v5 = vadd.f32 %v135_v4, %v134_v3 }
 0x28e   :  { %v137_v6 = vrot.slane %v136_v5, 1 }
 0x290   :  { %v138_v7 = vadd.f32 %v137_v6, %v136_v5 }
 0x292   :  { %158 = vpush %v138_v7 }
 0x2c3   :  { %s159_s5 = spop %158 }
 0x2c4   :  { %v140_v8 = vstv %s159_s5 }
 0x2c5   :  { %141 = vst [vmem:[#allocation12] sm:$0xff] %v140_v8 }
 0x2c6   :  { %237 = shalt.err (!%p234_p6)
}
 0x2c7   :  { %s238_s9 = scalar_lea.hbm %s329_s2, 128 }
 0x2c8   :  { %p239_p7 = scmp.ne.s32.totalorder %s329_s2, %s238_s9  ;;  %p242_p8 = scmp.lt.u32.totalorder %s238_s9, %s329_s2 }
 0x2ca   :  { %p244_p9 = pnand %p242_p8, %p239_p7 }
 0x2cc   :  { %247 = shalt.err (!%p244_p9)
}
 0x2cd   :  { %151 = dma.vmem_to_hbm [thread:$0]  %s149_s4, 128, %s329_s2, [#allocation9]  }
 0x2ce   :  { %252 = dma.done.wait [#allocation9], 128  }
 0x2cf   :  { %253 = vsyncadd [#allocation9], 4294967168 }
 0x2d0   :  { %155 = vsyncpa [#allocation8], 1 }
 0x2d1   :  { %156 = vsyncpa [#allocation11], 1 }
 0x2d2   :  { %157 = vsyncpa [#allocation9], 1 }

</bundles_post_ra>
